<compile_context>
chip_gen: v6e
topology: v6e:2x2x1
jax: 0.10.0
libtpu: 0.0.40
codegen_flags: <defaults>
</compile_context>

<pallas_src>
import functools
import math

import numpy as np
import jax
import jax.numpy as jnp
from jax.experimental import pallas as pl
from jax.experimental.pallas import tpu as pltpu


# ----------------------------------------------------------------------------
# Static helpers
# ----------------------------------------------------------------------------
def _choose_time_tile(L: int, s: int, target: int = 8192,
                      umid_budget_bytes: int = 4 << 20) -> int:
    """Largest tile that divides L, is a multiple of s and 128, is <= target,
    and keeps the constant (m, TL) upsample matrix within a VMEM budget."""
    base = (128 * s) // math.gcd(128, s)
    if L % base != 0:
        return L  # fall back to a single full-length tile
    n = L // base
    best = base
    for g in range(1, n + 1):
        if n % g != 0:
            continue
        tl = g * base
        if tl > target:
            continue
        m = tl // s
        if m * tl * 4 > umid_budget_bytes:
            continue
        best = tl
    return best


def _torch_linear_interp_matrix(in_size: int, out_size: int, scale_factor: float) -> np.ndarray:
    """Dense matrix matching F.interpolate(mode='linear', align_corners=False).
    Only used by the pure-JAX reference."""
    ratio = 1.0 / float(scale_factor)
    out_idx = np.arange(out_size, dtype=np.float64)
    src = ratio * (out_idx + 0.5) - 0.5
    src = np.maximum(src, 0.0)
    i0 = np.minimum(np.floor(src).astype(np.int64), in_size - 1)
    i1 = np.minimum(i0 + 1, in_size - 1)
    lam = src - i0
    w = np.zeros((out_size, in_size), dtype=np.float32)
    w[np.arange(out_size), i0] += (1.0 - lam).astype(np.float32)
    w[np.arange(out_size), i1] += lam.astype(np.float32)
    return w


# ----------------------------------------------------------------------------
# Pallas kernel: one (batch, time-tile) per grid step.
# ----------------------------------------------------------------------------
def _sine_generator_kernel(
    tap0_ref,    # (1, mpad)  f0 gathered at downsample tap-0 sample indices
    tap1_ref,    # (1, mpad)  f0 gathered at downsample tap-1 sample indices
    rand_ref,    # (D, 1)     random initial phase per harmonic (row 0 == 0)
    umid_ref,    # (m, TL)    constant upsample weights (interior window frames)
    uleft_ref,   # (1, TL)    constant upsample weights (left boundary frame)
    uright_ref,  # (1, TL)    constant upsample weights (right boundary frame)
    f0_ref,      # (1, TL)    f0 at sample rate (uv / noise amplitude)
    z_ref,       # (D, TL)    standard-normal noise
    sine_ref,    # (D, TL)    out: sine_waves (time-on-lanes layout)
    noise_ref,   # (D, TL)    out: noise
    carry_ref,   # (D, 1)     VMEM scratch: running frame-cumsum carry
    *,
    sampling_rate: float,
    upsample_scale: float,
    sine_amp: float,
    noise_std: float,
    voiced_threshold: float,
    w_down0: float,
    w_down1: float,
    rand_w: float,
    m: int,
):
    k = pl.program_id(1)
    n_k = pl.num_programs(1)
    D = z_ref.shape[0]
    mpad = tap0_ref.shape[-1]

    is_first = jnp.where(k == 0, 1.0, 0.0)
    is_last = jnp.where(k == n_k - 1, 1.0, 0.0)

    # ---------------- frame-rate stage ----------------
    harm = (jax.lax.broadcasted_iota(jnp.int32, (D, mpad), 0) + 1).astype(jnp.float32)
    inv_sr = 1.0 / sampling_rate
    x0 = tap0_ref[...] * harm * inv_sr
    # rad = (f0 * h / sr) mod 1 at the taps, then the 2-tap downsample lerp.
    down = w_down0 * (x0 - jnp.floor(x0))                                   # (D, mpad)
    if w_down1 != 0.0:
        x1 = tap1_ref[...] * harm * inv_sr
        down = down + w_down1 * (x1 - jnp.floor(x1))

    lane = jax.lax.broadcasted_iota(jnp.int32, (D, mpad), 1)

    if rand_w != 0.0:
        # rand_ini only reaches frames whose tap reads sample t == 0
        # (i.e. frame 0 of tile 0, with the downsample lerp weight rand_w).
        first_col = (lane == 0).astype(jnp.float32)
        down = down + (rand_ref[...] * (rand_w * is_first)) * first_col

    # Inclusive shift-and-add scan over frames (lane axis).  Columns 0..m hold
    # the real window (global frames k*m .. k*m+m); columns > m are padding.
    cum = down
    shift = 1
    while shift < m + 1:
        rolled = pltpu.roll(cum, shift, axis=1)
        cum = cum + jnp.where(lane >= shift, rolled, 0.0)
        shift *= 2

    @pl.when(k == 0)
    def _init_carry():
        carry_ref[...] = jnp.zeros_like(carry_ref)

    carry_in = carry_ref[...]                    # == global cumsum at frame k*m - 1
    cum = cum + carry_in                         # global cumsum for frames k*m .. k*m+m
    carry_ref[...] = cum[:, m - 1:m]             # carry for the next tile

    # 3-tap upsample window boundaries: global frames k*m-1 and k*m+m (edge clamped).
    left = is_first * cum[:, 0:1] + (1.0 - is_first) * carry_in
    right = is_last * cum[:, m - 1:m] + (1.0 - is_last) * cum[:, m:m + 1]

    # Keep sin() arguments bounded: drop an integer number of cycles per row.
    # Exact because upsample_scale is an integer and the per-sample upsample
    # weights sum to 1.
    base = jnp.floor(left)
    left = left - base
    right = right - base
    mid = cum[:, 0:m] - base                     # (D, m)

    # ---------------- sample-rate stage ----------------
    phase = jnp.dot(mid, umid_ref[...], preferred_element_type=jnp.float32)   # (D, TL)
    phase = phase + left * uleft_ref[...] + right * uright_ref[...]
    phase = phase * (2.0 * np.pi * upsample_scale)
    sines = jnp.sin(phase) * sine_amp

    f0 = f0_ref[...]                                         # (1, TL)
    uv = (f0 > voiced_threshold).astype(jnp.float32)
    noise_amp = uv * noise_std + (1.0 - uv) * (sine_amp / 3.0)
    noise = noise_amp * z_ref[...]                           # (D, TL)
    sine_ref[...] = (sines * uv + noise).astype(sine_ref.dtype)
    noise_ref[...] = noise.astype(noise_ref.dtype)


# ----------------------------------------------------------------------------
# Wrapper
# ----------------------------------------------------------------------------
def sine_generator_pallas(
    f0,                       # (B, L, 1) float32
    rand_ini,                 # (B, 1, D) uniform[0,1), col 0 == 0
    z,                        # (B, L, D) standard normal
    *,
    sampling_rate: int,
    upsample_scale: float,
    harmonic_num: int = 0,
    sine_amp: float = 0.1,
    noise_std: float = 0.003,
    voiced_threshold: float = 0.0,
    time_tile=None,
):
    B, L, _ = f0.shape
    D = harmonic_num + 1
    if float(upsample_scale) != float(int(upsample_scale)):
        raise NotImplementedError("tiled Pallas SineGenerator requires integer upsample_scale")
    s = int(upsample_scale)
    if L % s != 0:
        raise NotImplementedError("length must be a multiple of upsample_scale")
    Ld = L // s

    TL = _choose_time_tile(L, s) if time_tile is None else int(time_tile)
    assert L % TL == 0 and TL % s == 0 and (TL % 128 == 0 or TL == L), "bad time_tile"
    K = L // TL
    m = TL // s                                   # frames per tile
    mpad = ((m + 1 + 127) // 128) * 128           # lane-aligned frame-window width

    # ---- static downsample taps (torch linear interp, align_corners=False) ----
    if s % 2 == 0:
        off0, lam = s // 2 - 1, 0.5
    else:
        off0, lam = (s - 1) // 2, 0.0
    w_down0, w_down1 = 1.0 - lam, lam
    rand_w = w_down0 if off0 == 0 else 0.0        # weight of rand_ini at frame 0

    frames = np.minimum(np.arange(K)[:, None] * m + np.arange(mpad)[None, :], Ld - 1)
    idx0 = np.minimum(frames * s + off0, L - 1).astype(np.int32).reshape(-1)
    idx1 = np.minimum(frames * s + off0 + 1, L - 1).astype(np.int32).reshape(-1)

    f0_flat = f0[:, :, 0]                                       # (B, L)
    tap0 = f0_flat[:, idx0].reshape(B, K, 1, mpad)
    tap1 = f0_flat[:, idx1].reshape(B, K, 1, mpad)

    # ---- static upsample weights (periodic, identical for every tile) --------
    r = np.arange(s, dtype=np.float64)
    fracp = (r + 0.5) / s - 0.5
    wL = np.where(fracp < 0, -fracp, 0.0)
    wM = np.where(fracp < 0, 1.0 + fracp, 1.0 - fracp)
    wR = np.where(fracp < 0, 0.0, fracp)
    u_full = np.zeros((m + 2, TL), dtype=np.float64)
    for j in range(m):
        u_full[j, j * s:(j + 1) * s] += wL
        u_full[j + 1, j * s:(j + 1) * s] += wM
        u_full[j + 2, j * s:(j + 1) * s] += wR
    u_left = jnp.asarray(u_full[0:1].astype(np.float32))        # (1, TL)
    u_mid = jnp.asarray(u_full[1:m + 1].astype(np.float32))     # (m, TL)
    u_right = jnp.asarray(u_full[m + 1:m + 2].astype(np.float32))

    # ---- lane-dense (time-on-lanes) operands ---------------------------------
    f0_t = jnp.transpose(f0, (0, 2, 1))            # (B, 1, L)
    z_t = jnp.transpose(z, (0, 2, 1))              # (B, D, L)
    rand_t = jnp.transpose(rand_ini, (0, 2, 1))    # (B, D, 1)

    kernel = functools.partial(
        _sine_generator_kernel,
        sampling_rate=float(sampling_rate),
        upsample_scale=float(upsample_scale),
        sine_amp=float(sine_amp),
        noise_std=float(noise_std),
        voiced_threshold=float(voiced_threshold),
        w_down0=float(w_down0),
        w_down1=float(w_down1),
        rand_w=float(rand_w),
        m=m,
    )

    out_shape = (
        jax.ShapeDtypeStruct((B, D, L), f0.dtype),   # sine (time-on-lanes)
        jax.ShapeDtypeStruct((B, D, L), f0.dtype),   # noise
    )

    grid_spec = pltpu.PrefetchScalarGridSpec(
        num_scalar_prefetch=0,
        grid=(B, K),
        in_specs=[
            pl.BlockSpec((None, None, 1, mpad), lambda b, k: (b, k, 0, 0)),  # tap0
            pl.BlockSpec((None, None, 1, mpad), lambda b, k: (b, k, 0, 0)),  # tap1
            pl.BlockSpec((None, D, 1), lambda b, k: (b, 0, 0)),              # rand_ini
            pl.BlockSpec((m, TL), lambda b, k: (0, 0)),                      # u_mid
            pl.BlockSpec((1, TL), lambda b, k: (0, 0)),                      # u_left
            pl.BlockSpec((1, TL), lambda b, k: (0, 0)),                      # u_right
            pl.BlockSpec((None, 1, TL), lambda b, k: (b, 0, k)),             # f0
            pl.BlockSpec((None, D, TL), lambda b, k: (b, 0, k)),             # z
        ],
        out_specs=[
            pl.BlockSpec((None, D, TL), lambda b, k: (b, 0, k)),             # sine
            pl.BlockSpec((None, D, TL), lambda b, k: (b, 0, k)),             # noise
        ],
        scratch_shapes=[pltpu.VMEM((D, 1), jnp.float32)],
    )

    sine_t, noise_t = pl.pallas_call(
        kernel,
        out_shape=out_shape,
        grid_spec=grid_spec,
        compiler_params=pltpu.CompilerParams(
            dimension_semantics=("parallel", "arbitrary")),
    )(tap0, tap1, rand_t, u_mid, u_left, u_right, f0_t, z_t)

    sine = jnp.transpose(sine_t, (0, 2, 1))
    noise = jnp.transpose(noise_t, (0, 2, 1))
    uv = (f0 > voiced_threshold).astype(f0.dtype)   # trivial; computed outside the kernel
    return sine, uv, noise


# ----------------------------------------------------------------------------
# Pure-JAX reference (same math, same random draws) for verification
# ----------------------------------------------------------------------------
def sine_generator_ref(f0, rand_ini, z, *, sampling_rate, upsample_scale,
                       harmonic_num, sine_amp=0.1, noise_std=0.003,
                       voiced_threshold=0.0):
    B, L, _ = f0.shape
    D = harmonic_num + 1
    Ld = int(np.floor(L / upsample_scale))
    harm = jnp.arange(1, D + 1, dtype=f0.dtype).reshape(1, 1, D)
    w_down = jnp.asarray(_torch_linear_interp_matrix(L, Ld, 1.0 / upsample_scale))
    tril = jnp.asarray(np.tril(np.ones((Ld, Ld), dtype=np.float32)))
    w_up = jnp.asarray(_torch_linear_interp_matrix(Ld, L, upsample_scale))

    fn = f0 * harm
    x = fn / sampling_rate
    rad = x - jnp.floor(x)
    rad = rad.at[:, 0, :].add(rand_ini[:, 0, :])
    down = jnp.einsum("dl,bln->bdn", w_down, rad)
    cum = jnp.einsum("de,ben->bdn", tril, down)
    phase = jnp.einsum("ld,bdn->bln", w_up, cum) * (2.0 * np.pi * upsample_scale)
    sines = jnp.sin(phase) * sine_amp
    uv = (f0 > voiced_threshold).astype(f0.dtype)
    noise_amp = uv * noise_std + (1.0 - uv) * sine_amp / 3.0
    noise = noise_amp * z
    return sines * uv + noise, uv, noise


if __name__ == "__main__":
    key = jax.random.PRNGKey(0)
    B, L = 2, 512
    sampling_rate = 24000
    upsample_scale = 2.0
    harmonic_num = 7
    D = harmonic_num + 1

    k0, k1, k2, k3 = jax.random.split(key, 4)
    f0 = jax.random.uniform(k0, (B, L, 1), dtype=jnp.float32, minval=80.0, maxval=400.0)
    voiced = (jax.random.uniform(k3, (B, L, 1)) > 0.25).astype(jnp.float32)
    f0 = f0 * voiced  # some unvoiced (f0 == 0) frames to exercise the uv path

    rand_ini = jax.random.uniform(k1, (B, 1, D), dtype=jnp.float32)
    rand_ini = rand_ini.at[:, :, 0].set(0.0)          # rand_ini[:, 0] = 0
    z = jax.random.normal(k2, (B, L, D), dtype=jnp.float32)

    # time_tile=128 -> 4 time tiles per batch, exercising the cumsum carry path.
    sine, uv, noise = sine_generator_pallas(
        f0, rand_ini, z,
        sampling_rate=sampling_rate, upsample_scale=upsample_scale,
        harmonic_num=harmonic_num, time_tile=128)
    jax.block_until_ready((sine, uv, noise))

    sine_r, uv_r, noise_r = sine_generator_ref(
        f0, rand_ini, z,
        sampling_rate=sampling_rate, upsample_scale=upsample_scale,
        harmonic_num=harmonic_num)

    assert sine.shape == (B, L, D) and uv.shape == (B, L, 1) and noise.shape == (B, L, D)
    np.testing.assert_allclose(np.asarray(sine), np.asarray(sine_r), atol=2e-3, rtol=1e-3)
    np.testing.assert_allclose(np.asarray(uv), np.asarray(uv_r), atol=1e-6)
    np.testing.assert_allclose(np.asarray(noise), np.asarray(noise_r), atol=2e-3, rtol=1e-3)
    print("KERNEL_OK")
</pallas_src>

<mosaic_0001>
module attributes {stable_mosaic.version = 11 : i64} {
  func.func @_sine_generator_kernel(%arg0: i32, %arg1: i32, %arg2: memref<1x1x1x128xf32, #tpu.memory_space<vmem>>, %arg3: memref<1x1x1x128xf32, #tpu.memory_space<vmem>>, %arg4: memref<1x8x1xf32, #tpu.memory_space<vmem>>, %arg5: memref<64x128xf32, #tpu.memory_space<vmem>>, %arg6: memref<1x128xf32, #tpu.memory_space<vmem>>, %arg7: memref<1x128xf32, #tpu.memory_space<vmem>>, %arg8: memref<1x1x128xf32, #tpu.memory_space<vmem>>, %arg9: memref<1x8x128xf32, #tpu.memory_space<vmem>>, %arg10: memref<1x8x128xf32, #tpu.memory_space<vmem>>, %arg11: memref<1x8x128xf32, #tpu.memory_space<vmem>>, %arg12: memref<8x1xf32, #tpu.memory_space<vmem>>) attributes {dimension_semantics = [#tpu.dimension_semantics<parallel>, #tpu.dimension_semantics<arbitrary>], iteration_bounds = array<i64: 2, 4>, scalar_prefetch = 0 : i64, scratch_operands = 1 : i64, tpu.core_type = #tpu.core_type<tc>, window_params = [{transform_indices = @transform_0, window_bounds = array<i64: 1, 1, 1, 128>}, {transform_indices = @transform_1, window_bounds = array<i64: 1, 1, 1, 128>}, {transform_indices = @transform_2, window_bounds = array<i64: 1, 8, 1>}, {pipeline_mode = #tpu.pipeline_mode<synchronous>, transform_indices = @transform_3, window_bounds = array<i64: 64, 128>}, {pipeline_mode = #tpu.pipeline_mode<synchronous>, transform_indices = @transform_4, window_bounds = array<i64: 1, 128>}, {pipeline_mode = #tpu.pipeline_mode<synchronous>, transform_indices = @transform_5, window_bounds = array<i64: 1, 128>}, {transform_indices = @transform_6, window_bounds = array<i64: 1, 1, 128>}, {transform_indices = @transform_7, window_bounds = array<i64: 1, 8, 128>}, {transform_indices = @transform_8, window_bounds = array<i64: 1, 8, 128>}, {transform_indices = @transform_9, window_bounds = array<i64: 1, 8, 128>}]} {
    %c0_i32 = arith.constant 0 : i32
    %0 = arith.cmpi eq, %arg1, %c0_i32 : i32
    %cst = arith.constant 1.000000e+00 : f32
    %cst_0 = arith.constant 0.000000e+00 : f32
    %1 = arith.select %0, %cst, %cst_0 : f32
    %c3_i32 = arith.constant 3 : i32
    %2 = arith.cmpi eq, %arg1, %c3_i32 : i32
    %cst_1 = arith.constant 1.000000e+00 : f32
    %cst_2 = arith.constant 0.000000e+00 : f32
    %3 = arith.select %2, %cst_1, %cst_2 : f32
    %4 = tpu.iota {dimensions = array<i32: 0>} : vector<8x128xi32>
    %c1_i32 = arith.constant 1 : i32
    %5 = vector.broadcast %c1_i32 : i32 to vector<8x128xi32>
    %6 = arith.addi %4, %5 : vector<8x128xi32>
    %7 = arith.sitofp %6 : vector<8x128xi32> to vector<8x128xf32>
    %c0 = arith.constant 0 : index
    %c0_3 = arith.constant 0 : index
    %c0_4 = arith.constant 0 : index
    %c0_5 = arith.constant 0 : index
    %8 = vector.load %arg2[%c0, %c0_3, %c0_4, %c0_5] : memref<1x1x1x128xf32, #tpu.memory_space<vmem>>, vector<1x1x1x128xf32>
    %9 = vector.shape_cast %8 : vector<1x1x1x128xf32> to vector<1x128xf32>
    %10 = vector.broadcast %9 : vector<1x128xf32> to vector<8x128xf32>
    %11 = arith.mulf %10, %7 : vector<8x128xf32>
    %cst_6 = arith.constant 4.16666662E-5 : f32
    %12 = vector.broadcast %cst_6 : f32 to vector<8x128xf32>
    %13 = arith.mulf %11, %12 : vector<8x128xf32>
    %14 = math.floor %13 : vector<8x128xf32>
    %15 = arith.subf %13, %14 : vector<8x128xf32>
    %cst_7 = arith.constant 5.000000e-01 : f32
    %16 = vector.broadcast %cst_7 : f32 to vector<8x128xf32>
    %17 = arith.mulf %16, %15 : vector<8x128xf32>
    %c0_8 = arith.constant 0 : index
    %c0_9 = arith.constant 0 : index
    %c0_10 = arith.constant 0 : index
    %c0_11 = arith.constant 0 : index
    %18 = vector.load %arg3[%c0_8, %c0_9, %c0_10, %c0_11] : memref<1x1x1x128xf32, #tpu.memory_space<vmem>>, vector<1x1x1x128xf32>
    %19 = vector.shape_cast %18 : vector<1x1x1x128xf32> to vector<1x128xf32>
    %20 = vector.broadcast %19 : vector<1x128xf32> to vector<8x128xf32>
    %21 = arith.mulf %20, %7 : vector<8x128xf32>
    %cst_12 = arith.constant 4.16666662E-5 : f32
    %22 = vector.broadcast %cst_12 : f32 to vector<8x128xf32>
    %23 = arith.mulf %21, %22 : vector<8x128xf32>
    %24 = math.floor %23 : vector<8x128xf32>
    %25 = arith.subf %23, %24 : vector<8x128xf32>
    %cst_13 = arith.constant 5.000000e-01 : f32
    %26 = vector.broadcast %cst_13 : f32 to vector<8x128xf32>
    %27 = arith.mulf %26, %25 : vector<8x128xf32>
    %28 = arith.addf %17, %27 : vector<8x128xf32>
    %29 = tpu.iota {dimensions = array<i32: 1>} : vector<8x128xi32>
    %c0_i32_14 = arith.constant 0 : i32
    %30 = vector.broadcast %c0_i32_14 : i32 to vector<8x128xi32>
    %31 = arith.cmpi eq, %29, %30 : vector<8x128xi32>
    %32 = arith.extui %31 : vector<8x128xi1> to vector<8x128xi32>
    %33 = arith.sitofp %32 : vector<8x128xi32> to vector<8x128xf32>
    %c0_15 = arith.constant 0 : index
    %c0_16 = arith.constant 0 : index
    %c0_17 = arith.constant 0 : index
    %34 = vector.load %arg4[%c0_15, %c0_16, %c0_17] : memref<1x8x1xf32, #tpu.memory_space<vmem>>, vector<1x8x1xf32>
    %35 = vector.shape_cast %34 : vector<1x8x1xf32> to vector<8x1xf32>
    %cst_18 = arith.constant 5.000000e-01 : f32
    %36 = arith.mulf %cst_18, %1 : f32
    %37 = vector.broadcast %36 : f32 to vector<8x1xf32>
    %38 = arith.mulf %35, %37 : vector<8x1xf32>
    %39 = vector.broadcast %38 : vector<8x1xf32> to vector<8x128xf32>
    %40 = arith.mulf %39, %33 : vector<8x128xf32>
    %41 = arith.addf %28, %40 : vector<8x128xf32>
    %c1_i32_19 = arith.constant 1 : i32
    %42 = tpu.dynamic_rotate %41 by %c1_i32_19 dim 1 : vector<8x128xf32>, i32 -> vector<8x128xf32>
    %c1_i32_20 = arith.constant 1 : i32
    %43 = vector.broadcast %c1_i32_20 : i32 to vector<8x128xi32>
    %44 = arith.cmpi sge, %29, %43 : vector<8x128xi32>
    %cst_21 = arith.constant 0.000000e+00 : f32
    %45 = vector.broadcast %cst_21 : f32 to vector<8x128xf32>
    %46 = arith.select %44, %42, %45 : vector<8x128xi1>, vector<8x128xf32>
    %47 = arith.addf %41, %46 : vector<8x128xf32>
    %c2_i32 = arith.constant 2 : i32
    %48 = tpu.dynamic_rotate %47 by %c2_i32 dim 1 : vector<8x128xf32>, i32 -> vector<8x128xf32>
    %c2_i32_22 = arith.constant 2 : i32
    %49 = vector.broadcast %c2_i32_22 : i32 to vector<8x128xi32>
    %50 = arith.cmpi sge, %29, %49 : vector<8x128xi32>
    %cst_23 = arith.constant 0.000000e+00 : f32
    %51 = vector.broadcast %cst_23 : f32 to vector<8x128xf32>
    %52 = arith.select %50, %48, %51 : vector<8x128xi1>, vector<8x128xf32>
    %53 = arith.addf %47, %52 : vector<8x128xf32>
    %c4_i32 = arith.constant 4 : i32
    %54 = tpu.dynamic_rotate %53 by %c4_i32 dim 1 : vector<8x128xf32>, i32 -> vector<8x128xf32>
    %c4_i32_24 = arith.constant 4 : i32
    %55 = vector.broadcast %c4_i32_24 : i32 to vector<8x128xi32>
    %56 = arith.cmpi sge, %29, %55 : vector<8x128xi32>
    %cst_25 = arith.constant 0.000000e+00 : f32
    %57 = vector.broadcast %cst_25 : f32 to vector<8x128xf32>
    %58 = arith.select %56, %54, %57 : vector<8x128xi1>, vector<8x128xf32>
    %59 = arith.addf %53, %58 : vector<8x128xf32>
    %c8_i32 = arith.constant 8 : i32
    %60 = tpu.dynamic_rotate %59 by %c8_i32 dim 1 : vector<8x128xf32>, i32 -> vector<8x128xf32>
    %c8_i32_26 = arith.constant 8 : i32
    %61 = vector.broadcast %c8_i32_26 : i32 to vector<8x128xi32>
    %62 = arith.cmpi sge, %29, %61 : vector<8x128xi32>
    %cst_27 = arith.constant 0.000000e+00 : f32
    %63 = vector.broadcast %cst_27 : f32 to vector<8x128xf32>
    %64 = arith.select %62, %60, %63 : vector<8x128xi1>, vector<8x128xf32>
    %65 = arith.addf %59, %64 : vector<8x128xf32>
    %c16_i32 = arith.constant 16 : i32
    %66 = tpu.dynamic_rotate %65 by %c16_i32 dim 1 : vector<8x128xf32>, i32 -> vector<8x128xf32>
    %c16_i32_28 = arith.constant 16 : i32
    %67 = vector.broadcast %c16_i32_28 : i32 to vector<8x128xi32>
    %68 = arith.cmpi sge, %29, %67 : vector<8x128xi32>
    %cst_29 = arith.constant 0.000000e+00 : f32
    %69 = vector.broadcast %cst_29 : f32 to vector<8x128xf32>
    %70 = arith.select %68, %66, %69 : vector<8x128xi1>, vector<8x128xf32>
    %71 = arith.addf %65, %70 : vector<8x128xf32>
    %c32_i32 = arith.constant 32 : i32
    %72 = tpu.dynamic_rotate %71 by %c32_i32 dim 1 : vector<8x128xf32>, i32 -> vector<8x128xf32>
    %c32_i32_30 = arith.constant 32 : i32
    %73 = vector.broadcast %c32_i32_30 : i32 to vector<8x128xi32>
    %74 = arith.cmpi sge, %29, %73 : vector<8x128xi32>
    %cst_31 = arith.constant 0.000000e+00 : f32
    %75 = vector.broadcast %cst_31 : f32 to vector<8x128xf32>
    %76 = arith.select %74, %72, %75 : vector<8x128xi1>, vector<8x128xf32>
    %77 = arith.addf %71, %76 : vector<8x128xf32>
    %c64_i32 = arith.constant 64 : i32
    %78 = tpu.dynamic_rotate %77 by %c64_i32 dim 1 : vector<8x128xf32>, i32 -> vector<8x128xf32>
    %c64_i32_32 = arith.constant 64 : i32
    %79 = vector.broadcast %c64_i32_32 : i32 to vector<8x128xi32>
    %80 = arith.cmpi sge, %29, %79 : vector<8x128xi32>
    %cst_33 = arith.constant 0.000000e+00 : f32
    %81 = vector.broadcast %cst_33 : f32 to vector<8x128xf32>
    %82 = arith.select %80, %78, %81 : vector<8x128xi1>, vector<8x128xf32>
    %83 = arith.addf %77, %82 : vector<8x128xf32>
    %c0_i32_34 = arith.constant 0 : i32
    %84 = arith.cmpi eq, %arg1, %c0_i32_34 : i32
    %85 = arith.extui %84 : i1 to i32
    %c0_i32_35 = arith.constant 0 : i32
    %86 = arith.cmpi ne, %85, %c0_i32_35 : i32
    scf.if %86 {
      %cst_67 = arith.constant 0.000000e+00 : f32
      %156 = vector.broadcast %cst_67 : f32 to vector<8x1xf32>
      %c0_68 = arith.constant 0 : index
      %c0_69 = arith.constant 0 : index
      %157 = vector.load %arg12[%c0_68, %c0_69] : memref<8x1xf32, #tpu.memory_space<vmem>>, vector<8x1xf32>
      tpu.vector_store %arg12[%c0_68, %c0_69], %156 {strides = array<i32>} : memref<8x1xf32, #tpu.memory_space<vmem>>, vector<8x1xf32>,
    } else {
    }
    %c0_36 = arith.constant 0 : index
    %c0_37 = arith.constant 0 : index
    %87 = vector.load %arg12[%c0_36, %c0_37] : memref<8x1xf32, #tpu.memory_space<vmem>>, vector<8x1xf32>
    %88 = vector.broadcast %87 : vector<8x1xf32> to vector<8x128xf32>
    %89 = arith.addf %83, %88 : vector<8x128xf32>
    %90 = vector.extract_strided_slice %89 {offsets = [0, 63], sizes = [8, 1], strides = [1, 1]} : vector<8x128xf32> to vector<8x1xf32>
    %c0_38 = arith.constant 0 : index
    %c0_39 = arith.constant 0 : index
    %91 = vector.load %arg12[%c0_38, %c0_39] : memref<8x1xf32, #tpu.memory_space<vmem>>, vector<8x1xf32>
    tpu.vector_store %arg12[%c0_38, %c0_39], %90 {strides = array<i32>} : memref<8x1xf32, #tpu.memory_space<vmem>>, vector<8x1xf32>,
    %92 = vector.extract_strided_slice %89 {offsets = [0, 0], sizes = [8, 1], strides = [1, 1]} : vector<8x128xf32> to vector<8x1xf32>
    %93 = vector.broadcast %1 : f32 to vector<8x1xf32>
    %94 = arith.mulf %93, %92 : vector<8x1xf32>
    %cst_40 = arith.constant 1.000000e+00 : f32
    %95 = arith.subf %cst_40, %1 : f32
    %96 = vector.broadcast %95 : f32 to vector<8x1xf32>
    %97 = arith.mulf %96, %87 : vector<8x1xf32>
    %98 = arith.addf %94, %97 : vector<8x1xf32>
    %99 = vector.extract_strided_slice %89 {offsets = [0, 63], sizes = [8, 1], strides = [1, 1]} : vector<8x128xf32> to vector<8x1xf32>
    %100 = vector.broadcast %3 : f32 to vector<8x1xf32>
    %101 = arith.mulf %100, %99 : vector<8x1xf32>
    %cst_41 = arith.constant 1.000000e+00 : f32
    %102 = arith.subf %cst_41, %3 : f32
    %103 = vector.extract_strided_slice %89 {offsets = [0, 64], sizes = [8, 1], strides = [1, 1]} : vector<8x128xf32> to vector<8x1xf32>
    %104 = vector.broadcast %102 : f32 to vector<8x1xf32>
    %105 = arith.mulf %104, %103 : vector<8x1xf32>
    %106 = arith.addf %101, %105 : vector<8x1xf32>
    %107 = math.floor %98 : vector<8x1xf32>
    %108 = arith.subf %98, %107 : vector<8x1xf32>
    %109 = arith.subf %106, %107 : vector<8x1xf32>
    %110 = vector.extract_strided_slice %89 {offsets = [0, 0], sizes = [8, 64], strides = [1, 1]} : vector<8x128xf32> to vector<8x64xf32>
    %111 = vector.broadcast %107 : vector<8x1xf32> to vector<8x64xf32>
    %112 = arith.subf %110, %111 : vector<8x64xf32>
    %c0_42 = arith.constant 0 : index
    %c0_43 = arith.constant 0 : index
    %113 = vector.load %arg5[%c0_42, %c0_43] : memref<64x128xf32, #tpu.memory_space<vmem>>, vector<64x128xf32>
    %cst_44 = arith.constant dense<0.000000e+00> : vector<8x128xf32>
    %114 = tpu.matmul %112, %113, %cst_44 {dimension_numbers = #tpu.dot_dimension_numbers<[1], [0], [0], [1], [0, 0, 1, 1], [], []>} : vector<8x64xf32>, vector<64x128xf32>, vector<8x128xf32> -> vector<8x128xf32>
    %c0_45 = arith.constant 0 : index
    %c0_46 = arith.constant 0 : index
    %115 = vector.load %arg6[%c0_45, %c0_46] : memref<1x128xf32, #tpu.memory_space<vmem>>, vector<1x128xf32>
    %116 = vector.broadcast %108 : vector<8x1xf32> to vector<8x128xf32>
    %117 = vector.broadcast %115 : vector<1x128xf32> to vector<8x128xf32>
    %118 = arith.mulf %116, %117 : vector<8x128xf32>
    %119 = arith.addf %114, %118 : vector<8x128xf32>
    %c0_47 = arith.constant 0 : index
    %c0_48 = arith.constant 0 : index
    %120 = vector.load %arg7[%c0_47, %c0_48] : memref<1x128xf32, #tpu.memory_space<vmem>>, vector<1x128xf32>
    %121 = vector.broadcast %109 : vector<8x1xf32> to vector<8x128xf32>
    %122 = vector.broadcast %120 : vector<1x128xf32> to vector<8x128xf32>
    %123 = arith.mulf %121, %122 : vector<8x128xf32>
    %124 = arith.addf %119, %123 : vector<8x128xf32>
    %cst_49 = arith.constant 12.566371 : f32
    %125 = vector.broadcast %cst_49 : f32 to vector<8x128xf32>
    %126 = arith.mulf %124, %125 : vector<8x128xf32>
    %127 = math.sin %126 : vector<8x128xf32>
    %cst_50 = arith.constant 1.000000e-01 : f32
    %128 = vector.broadcast %cst_50 : f32 to vector<8x128xf32>
    %129 = arith.mulf %127, %128 : vector<8x128xf32>
    %c0_51 = arith.constant 0 : index
    %c0_52 = arith.constant 0 : index
    %c0_53 = arith.constant 0 : index
    %130 = vector.load %arg8[%c0_51, %c0_52, %c0_53] : memref<1x1x128xf32, #tpu.memory_space<vmem>>, vector<1x1x128xf32>
    %131 = vector.shape_cast %130 : vector<1x1x128xf32> to vector<1x128xf32>
    %cst_54 = arith.constant 0.000000e+00 : f32
    %132 = vector.broadcast %cst_54 : f32 to vector<1x128xf32>
    %133 = arith.cmpf ogt, %131, %132 : vector<1x128xf32>
    %134 = arith.extui %133 : vector<1x128xi1> to vector<1x128xi32>
    %135 = arith.sitofp %134 : vector<1x128xi32> to vector<1x128xf32>
    %cst_55 = arith.constant 3.000000e-03 : f32
    %136 = vector.broadcast %cst_55 : f32 to vector<1x128xf32>
    %137 = arith.mulf %135, %136 : vector<1x128xf32>
    %cst_56 = arith.constant 1.000000e+00 : f32
    %138 = vector.broadcast %cst_56 : f32 to vector<1x128xf32>
    %139 = arith.subf %138, %135 : vector<1x128xf32>
    %cst_57 = arith.constant 0.0333333351 : f32
    %140 = vector.broadcast %cst_57 : f32 to vector<1x128xf32>
    %141 = arith.mulf %139, %140 : vector<1x128xf32>
    %142 = arith.addf %137, %141 : vector<1x128xf32>
    %c0_58 = arith.constant 0 : index
    %c0_59 = arith.constant 0 : index
    %c0_60 = arith.constant 0 : index
    %143 = vector.load %arg9[%c0_58, %c0_59, %c0_60] : memref<1x8x128xf32, #tpu.memory_space<vmem>>, vector<1x8x128xf32>
    %144 = vector.shape_cast %143 : vector<1x8x128xf32> to vector<8x128xf32>
    %145 = vector.broadcast %142 : vector<1x128xf32> to vector<8x128xf32>
    %146 = arith.mulf %145, %144 : vector<8x128xf32>
    %147 = vector.broadcast %135 : vector<1x128xf32> to vector<8x128xf32>
    %148 = arith.mulf %129, %147 : vector<8x128xf32>
    %149 = arith.addf %148, %146 : vector<8x128xf32>
    %c0_61 = arith.constant 0 : index
    %c0_62 = arith.constant 0 : index
    %c0_63 = arith.constant 0 : index
    %150 = vector.load %arg10[%c0_61, %c0_62, %c0_63] : memref<1x8x128xf32, #tpu.memory_space<vmem>>, vector<1x8x128xf32>
    %151 = vector.shape_cast %150 : vector<1x8x128xf32> to vector<8x128xf32>
    %152 = vector.shape_cast %149 : vector<8x128xf32> to vector<1x8x128xf32>
    tpu.vector_store %arg10[%c0_61, %c0_62, %c0_63], %152 {strides = array<i32>} : memref<1x8x128xf32, #tpu.memory_space<vmem>>, vector<1x8x128xf32>,
    %c0_64 = arith.constant 0 : index
    %c0_65 = arith.constant 0 : index
    %c0_66 = arith.constant 0 : index
    %153 = vector.load %arg11[%c0_64, %c0_65, %c0_66] : memref<1x8x128xf32, #tpu.memory_space<vmem>>, vector<1x8x128xf32>
    %154 = vector.shape_cast %153 : vector<1x8x128xf32> to vector<8x128xf32>
    %155 = vector.shape_cast %146 : vector<8x128xf32> to vector<1x8x128xf32>
    tpu.vector_store %arg11[%c0_64, %c0_65, %c0_66], %155 {strides = array<i32>} : memref<1x8x128xf32, #tpu.memory_space<vmem>>, vector<1x8x128xf32>,
    return
  }
  func.func @transform_0(%arg0: i32, %arg1: i32) -> (i32, i32, i32, i32) {
    %c0_i32 = arith.constant 0 : i32
    %c0_i32_0 = arith.constant 0 : i32
    %c0_i32_1 = arith.constant 0 : i32
    return %arg0, %arg1, %c0_i32, %c0_i32_0 : i32, i32, i32, i32
  }
  func.func @transform_1(%arg0: i32, %arg1: i32) -> (i32, i32, i32, i32) {
    %c0_i32 = arith.constant 0 : i32
    %c0_i32_0 = arith.constant 0 : i32
    %c0_i32_1 = arith.constant 0 : i32
    return %arg0, %arg1, %c0_i32, %c0_i32_0 : i32, i32, i32, i32
  }
  func.func @transform_2(%arg0: i32, %arg1: i32) -> (i32, i32, i32) {
    %c0_i32 = arith.constant 0 : i32
    %c0_i32_0 = arith.constant 0 : i32
    %c0_i32_1 = arith.constant 0 : i32
    return %arg0, %c0_i32, %c0_i32_0 : i32, i32, i32
  }
  func.func @transform_3(%arg0: i32, %arg1: i32) -> (i32, i32) {
    %c0_i32 = arith.constant 0 : i32
    %c0_i32_0 = arith.constant 0 : i32
    %c0_i32_1 = arith.constant 0 : i32
    return %c0_i32, %c0_i32_0 : i32, i32
  }
  func.func @transform_4(%arg0: i32, %arg1: i32) -> (i32, i32) {
    %c0_i32 = arith.constant 0 : i32
    %c0_i32_0 = arith.constant 0 : i32
    %c0_i32_1 = arith.constant 0 : i32
    return %c0_i32, %c0_i32_0 : i32, i32
  }
  func.func @transform_5(%arg0: i32, %arg1: i32) -> (i32, i32) {
    %c0_i32 = arith.constant 0 : i32
    %c0_i32_0 = arith.constant 0 : i32
    %c0_i32_1 = arith.constant 0 : i32
    return %c0_i32, %c0_i32_0 : i32, i32
  }
  func.func @transform_6(%arg0: i32, %arg1: i32) -> (i32, i32, i32) {
    %c0_i32 = arith.constant 0 : i32
    %c0_i32_0 = arith.constant 0 : i32
    return %arg0, %c0_i32, %arg1 : i32, i32, i32
  }
  func.func @transform_7(%arg0: i32, %arg1: i32) -> (i32, i32, i32) {
    %c0_i32 = arith.constant 0 : i32
    %c0_i32_0 = arith.constant 0 : i32
    return %arg0, %c0_i32, %arg1 : i32, i32, i32
  }
  func.func @transform_8(%arg0: i32, %arg1: i32) -> (i32, i32, i32) {
    %c0_i32 = arith.constant 0 : i32
    %c0_i32_0 = arith.constant 0 : i32
    return %arg0, %c0_i32, %arg1 : i32, i32, i32
  }
  func.func @transform_9(%arg0: i32, %arg1: i32) -> (i32, i32, i32) {
    %c0_i32 = arith.constant 0 : i32
    %c0_i32_0 = arith.constant 0 : i32
    return %arg0, %c0_i32, %arg1 : i32, i32, i32
  }
}

</mosaic_0001>

<bundles_post_ra>
// kernel: tpu_custom_call.1
= control target key start
LH: loop header
LB: loop body
LE: loop exit
PB: predicated region body
PF: predicated region fallthrough
CT: control target
= control target key end

     0   :  { %s1857_s0 = inlined_call_operand.vmem [shape: f32[2,4,1,128], index: 0, kind: input, shape index: {}]   ;;  %s1858_s1 = inlined_call_operand.vmem [shape: f32[2,4,1,128], index: 1, kind: input, shape index: {}]   ;;  %s1859_s2 = inlined_call_operand.vmem [shape: f32[2,8,1], index: 2, kind: input, shape index: {}]   ;;  %s1860_s3 = inlined_call_operand.hbm [shape: f32[64,128], index: 3, kind: input, shape index: {}]   ;;  %s1861_s4 = inlined_call_operand.vmem [shape: f32[1,128], index: 4, kind: input, shape index: {}]   ;;  %s1862_s5 = inlined_call_operand.vmem [shape: f32[1,128], index: 5, kind: input, shape index: {}]   ;;  %s1863_s6 = inlined_call_operand.vmem [shape: f32[2,1,512], index: 6, kind: input, shape index: {}]   ;;  %s1864_s7 = inlined_call_operand.hbm [shape: f32[2,8,512], index: 7, kind: input, shape index: {}]   ;;  %s1865_s8 = inlined_call_operand.hbm [shape: f32[2,8,512], index: 8, kind: output, shape index: {0}]   ;;  %s1866_s9 = inlined_call_operand.hbm [shape: f32[2,8,512], index: 9, kind: output, shape index: {1}]  }
   0x1   :  { %1875 = sst [smem:[#allocation19_spill]] %s1857_s0 }
   0x2   :  { %1876 = sst [smem:[#allocation20_spill]] %s1858_s1 }
   0x3   :  { %1877 = sst [smem:[#allocation21_spill]] %s1860_s3 }
   0x4   :  { %1878 = sst [smem:[#allocation22_spill]] %s1861_s4 }
   0x5   :  { %1879 = sst [smem:[#allocation23_spill]] %s1862_s5 }
   0x6   :  { %1880 = sst [smem:[#allocation24_spill]] %s1865_s8 }
   0x7   :  { %1881 = sst [smem:[#allocation25_spill]] %s1866_s9 }
   0x8   :  { %15 = vsyncpa [#allocation4], 0 }
   0x9   :  { %16 = vsyncpa [#allocation7], 0 }
   0xa   :  { %18 = vsyncpa [#allocation7 + $0x1], 0 }
   0xb   :  { %19 = vsyncpa [#allocation5], 0 }
   0xc   :  { %21 = vsyncpa [#allocation5 + $0x1], 0 }
   0xd   :  { %22 = vsyncpa [#allocation10], 0 }
   0xe   :  { %24 = vsyncpa [#allocation10 + $0x1], 0  ;;  %s1547_s30 = smov 0   ;;  %s1549_s10 = smov 0  }
   0xf   :  { %s1551_s11 = smov 0   ;;  %s1553_s12 = smov 0  }
  0x10   :  { %s1555_s13 = smov 0   ;;  %s1557_s14 = smov 0  }
  0x11   :  { %s1559_s15 = smov 0   ;;  %s1561_s16 = smov 0  }
  0x12 LB: > { %1882 = sst [smem:[#allocation15_spill]] %s1440_s30  ;;  %s1090_s17 = sadd.s32 4294967295, %s1468_s16   ;;  %s1468_s16 = sphi %s1561_s16, %s30_s16   ;;  %s1464_s15 = sphi %s1559_s15, %s1913_s15   ;;  %s1460_s14 = sphi %s1557_s14, %s1912_s14   ;;  %s1456_s13 = sphi %s1555_s13, %s1911_s13   ;;  %s1452_s12 = sphi %s1553_s12, %s1910_s12   ;;  %s1448_s11 = sphi %s1551_s11, %s1909_s11   ;;  %s1444_s10 = sphi %s1549_s10, %s1908_s10   ;;  %s1440_s30 = sphi %s1547_s30, %s1907_s30  }
  0x13   : > { %s1091_s18 = sadd.s32 4294967294, %s1468_s16   ;;  %p237_p0 = scmp.ne.s32.totalorder %s1444_s10, %s1440_s30 }
  0x14   : > { %p1591_p1 = scmp.eq.s32.totalorder %s1090_s17, 0  ;;  %p1595_p2 = scmp.eq.s32.totalorder %s1090_s17, 7 }
  0x15   : > { %p269_p3 = scmp.eq.s32.totalorder %s1091_s18, 7  ;;  %p1092_p5 = scmp.ge.s32.totalorder %s1468_s16, 1 }
  0x16   : > { %p1601_p4 = por %p1591_p1, %p237_p0  ;;  %p304_p7 = scmp.lt.s32.totalorder %s1468_s16, 9 }
  0x17   : > { %p1606_p6 = por %p269_p3, %p237_p0  ;;  %s1470_s24 = smov [#allocation3]  }
  0x18   : > { %s1885_s21 = scalar_select %p1601_p4, 1, 0 }
  0x19   : > { %s1886_s22 = scalar_select %p1606_p6, 1, 0 }
  0x1a   : > { %p1611_p8 = pnand %p1092_p5, %p304_p7  ;;  %s316_s25 = sshll.u32 %s1470_s24, 4  ;;  %s317_s25 = int_to_ptr.vmem [resolvable:$true] %s316_s25 }
  0x1b   : > { %1887 = sst [smem:[#allocation16_spill]] %s1886_s22  ;;  %s1295_s26 = scalar_lea.vmem %s317_s25, 1024 }
  0x1c   : > { %p1169_p9 = pneg %p1611_p8  ;;  %p1296_p12 = scmp.ne.s32.totalorder %s317_s25, %s1295_s26 }
  0x1d   : > { %p1303_p3 = scmp.lt.s32.totalorder %s317_s25, %s317_s25  ;;  %p1304_p6 = scmp.lt.s32.totalorder %s1295_s26, %s1295_s26 }
  0x1e   : > { %p1170_p10 = pnand %p1169_p9, %p1591_p1 }
  0x1f   : > { %p1305_p4 = por %p1304_p6, %p1303_p3 }
  0x20   : > { %p1286_p11 = pneg %p1170_p10 }
  0x22   : > { %p1298_p13 = pnand %p1296_p12, %p1286_p11 }
  0x24   : > { %p1299_p0 = pneg %p1298_p13 }
  0x26   : > { %p1306_p5 = pnand %p1305_p4, %p1299_p0 }
  0x28   : > { %1309 = shalt.err (!%p1306_p5)
}
  0x29   : > { %s1471_s27 = smov 128   ;;  %s1472_s28 = smov 8  }
  0x2a   : > { %s1889_s3 = sld [smem:[#allocation21_spill]]  ;;  %s39_s18 = sadd.s32 1, %s1460_s14 }
  0x2b   : > { %p40_p4 = scmp.ge.s32.totalorder %s39_s18, 4  ;;  %s42_s24 = sadd.s32 1, %s1464_s15 }
  0x2c   : > { %s224_s26 = sadd.s32 1, %s1448_s11  ;;  %p231_p6 = scmp.ne.s32.totalorder %s1448_s11, %s1444_s10 }
  0x2d   : > { %s1915_s18 = smov (%p40_p4, %s39_s18), 0  ;;  %s1917_s24 = smov (!%p40_p4, %s42_s24), %s1464_s15 }
  0x2e   : > { %1890 = sst [smem:[#allocation17_spill]] %s1915_s18  ;;  %s220_s22 = ssub.s32 %s1460_s14, %s1915_s18 }
  0x2f   : > { %p232_p7 = scmp.eq.s32.totalorder %s1468_s16, 0  ;;  %p44_p9 = scmp.ge.s32.totalorder %s1917_s24, 2 }
  0x30   : > { %1172 = dma.hbm_to_vmem [thread:$0]  (!%p1170_p10), %s1889_s3, 1024, %s317_s25, [#allocation4], %s1471_s27, %s1471_s27, %s1472_s28  }
  0x31   : > { %p1635_p11 = por %p1595_p2, %p231_p6  ;;  %p1639_p10 = por %p232_p7, %p231_p6 }
  0x32   : > { %p1185_p12 = scmp.lt.s32.totalorder %s1468_s16, 8  ;;  %s1919_s24 = smov (%p44_p9, %s1917_s24), 0 }
  0x33   : > { %s1891_s29 = scalar_select %p1635_p11, 1, 0 }
  0x34   : > { %s373_s27 = sand.u32 1, %s1448_s11   ;;  %s1096_s28 = sshll.u32 %s1464_s15, 2 }
  0x35   : > { %1892 = sst [smem:[#allocation18_spill]] %s1891_s29  ;;  %s219_s17 = ssub.s32 %s1464_s15, %s1919_s24 }
  0x36   : > { %s221_s3 = sor.u32 %s220_s22, %s219_s17  ;;  %s1095_s18 = sshll.u32 %s373_s27, 3 }
  0x37   : > { %p222_p13 = scmp.eq.s32.totalorder %s221_s3, 0  ;;  %s382_s20 = sadd.s32 %s1460_s14, %s1096_s28 }
  0x38   : > { %s377_s30 = scalar_lea.vmem [#allocation6], %s1095_s18  ;;  %s1097_s4 = sshll.u32 %s382_s20, 7 }
  0x39   : > { %s386_s8 = sshll.u32 %s377_s30, 4  ;;  %s384_s1 = scalar_lea.hbm %s1864_s7, %s1097_s4  ;;  %s387_s8 = int_to_ptr.vmem [resolvable:$true] %s386_s8 }
  0x3a   : > { %s1652_s5 = scalar_select %p222_p13, %s1448_s11, %s224_s26  }
  0x3b   : > { %p1661_p2 = pnand %p1185_p12, %p1639_p10  ;;  %s374_s22 = scalar_lea.sflag [#allocation7], %s373_s27 }
  0x3c   : > { %s1323_s3 = scalar_lea.vmem %s387_s8, 128  ;;  %s1473_s30 = smov [#allocation6]  }
  0x3d   : > { %p1312_p0 = pneg %p1661_p2  ;;  %p1324_p3 = scmp.ne.s32.totalorder %s387_s8, %s1323_s3 }
  0x3e   : > { %s1328_s18 = sshll.u32 %s1473_s30, 4  ;;  %s1329_s18 = int_to_ptr.vmem [resolvable:$false] %s1328_s18 }
  0x3f   : > { %p1326_p5 = pnand %p1324_p3, %p1312_p0  ;;  %s1330_s26 = scalar_lea.vmem %s1329_s18, 256 }
  0x40   : > { %p1331_p6 = scmp.lt.s32.totalorder %s387_s8, %s1329_s18  ;;  %p1332_p7 = scmp.lt.s32.totalorder %s1330_s26, %s1323_s3 }
  0x41   : > { %p1327_p4 = pneg %p1326_p5 }
  0x42   : > { %p1333_p9 = por %p1332_p7, %p1331_p6 }
  0x44   : > { %p1334_p13 = pnand %p1333_p9, %p1327_p4 }
  0x46   : > { %1337 = shalt.err (!%p1334_p13)
}
  0x47   : > { %1176 = dma.hbm_to_vmem [thread:$0]  (!%p1661_p2), %s384_s1, 128, %s387_s8, %s374_s22  }
  0x48   : > { %395 = sbr.rel (%p1611_p8) target bundleno = 1616 (0x650), region = 52 }
  0x4d   : > { %1423 = dma.done.wait (%p1591_p1), [#allocation4], 1024  }
  0x4e   : > { %1425 = vsyncadd (%p1591_p1), [#allocation4], 4294966272  ;;  %s1676_s4 = sand.u32 1, %s1444_s10   ;;  %p1895_p10 = scmp.ne.s32.totalorder %s1885_s21, 0 }
  0x4f   : > { %s1679_s9 = sshll.u32 %s1676_s4, 3  ;;  %s402_s0 = scalar_lea.sflag [#allocation7], %s1676_s4 }
  0x50   : > { %s405_s1 = scalar_lea.vmem [#allocation6], %s1679_s9 }
  0x51   : > { %1427 = dma.done.wait (%p1895_p10), %s402_s0, 128  }
  0x52   : > { %1429 = vsyncadd (%p1895_p10), %s402_s0, 4294967168  ;;  %p470_p1 = scmp.lt.s32.totalorder %s1456_s13, 1  ;;  %p472_p8 = scmp.lt.s32.totalorder %s1452_s12, 3  ;;  %v1474_v0 = vmov 0   ;;  %v499_v4 = vlaneseq  ;;  %v1475_v21 = vmov 0.0  }
  0x53   : > { %1276 = vset.pattern.permute.xlu0 %v1474_v0  ;;  %p495_p12 = scmp.eq.s32.totalorder %s1452_s12, 0  ;;  %s1896_s0 = sld [smem:[#allocation19_spill]] }
  0x54   : > { %s471_s8 = scalar_select %p470_p1, %s1456_s13, 1  ;;  %v1705_v5 = vshrl.u32 %v499_v4, 7  ;;  %v529_v16 = vand.u32 127, %v499_v4 }
  0x55   : > { %s473_s19 = scalar_select %p472_p8, %s1452_s12, 3 }
  0x56   : > { %s1103_s23 = sshll.u32 %s471_s8, 2  ;;  %s1105_s29 = sshll.u32 %s471_s8, 3  ;;  %v501_v6 = vadd.s32 1, %v1705_v5  ;;  %vm530_vm0 = vcmp.eq.s32.totalorder %v529_v16, 0  ;;  %vm546_vm1 = vcmp.ge.s32.totalorder %v529_v16, 1  ;;  %vm551_vm2 = vcmp.ge.s32.totalorder %v529_v16, 2 }
  0x57   : > { %s1693_s25 = sadd.s32 %s1103_s23, %s473_s19  ;;  %s487_s28 = scalar_lea.vmem %s1859_s2, %s1105_s29  ;;  %v1109_v22 = vsel %vm530_vm0, 1.0, %v1475_v21  ;;  %vm556_vm3 = vcmp.ge.s32.totalorder %v529_v16, 4  ;;  %vm561_vm4 = vcmp.ge.s32.totalorder %v529_v16, 8  ;;  %vm566_vm5 = vcmp.ge.s32.totalorder %v529_v16, 16 }
  0x58   : > { %s494_s22 = scalar_lea.vmem %s1863_s6, %s1693_s25  ;;  %v533_v1 = vld [vmem:[%s487_s28] sm:$0xff]  ;;  %s1897_s29 = sld [smem:[#allocation20_spill]]  ;;  %v502_v7 = vcvt.s32.f32 %v501_v6  ;;  %vm571_vm6 = vcmp.ge.s32.totalorder %v529_v16, 32  ;;  %vm576_vm7 = vcmp.ge.s32.totalorder %v529_v16, 64 }
  0x59   : > { %s1702_s3 = scalar_select %p495_p12, 1.0, 0.0 }
  0x5a   : > { %s476_s8 = scalar_lea.vmem %s1896_s0, %s1693_s25  ;;  %s1476_s21 = smov 1  }
  0x5b   : > { %s534_s30 = smul.f32 0.5, %s1702_s3  ;;  %v1107_v8 = vld [vmem:[%s476_s8] ss:$0 sm:$0xff]  ;;  %s1477_s28 = smov 2  }
  0x5c   : > { %v510_v10 = vmul.f32 %v1107_v8, %v502_v7  ;;  %s1478_s17 = smov 4   ;;  %s1479_s20 = smov 8  }
  0x5d   : > { %v535_v2 = vstv %s534_s30  ;;  %s1480_s30 = smov 16   ;;  %s1481_s18 = smov 32  }
  0x5e   : > { %v536_v3 = vmul.f32 %v535_v2, %v533_v1  ;;  %s483_s27 = scalar_lea.vmem %s1897_s29, %s1693_s25  ;;  %v511_v12 = vmul.f32 4.1666666e-05, %v510_v10  ;;  %p497_p2 = scmp.eq.s32.totalorder %s1452_s12, 3 }
  0x5f   : > { %v1108_v9 = vld [vmem:[%s483_s27] ss:$0 sm:$0xff]  ;;  %s1482_s0 = smov 64   ;;  %s462_s8 = scalar_lea.vmem [#allocation8], %s1679_s9 }
  0x60   : > { %539 = vperm.xlu0 %1276, %v536_v3   ;;  %v522_v11 = vmul.f32 %v1108_v9, %v502_v7  ;;  %v512_v14 = vfloor.f32 %v511_v12  ;;  %s1718_s26 = scalar_select %p497_p2, 1.0, 0.0 }
  0x61   : > { %s469_s19 = scalar_lea.vmem [#allocation9], %s1679_s9  ;;  %p1110_p0 = scmp.ne.s32.totalorder %s1452_s12, 0 }
  0x62   : > { %v523_v13 = vmul.f32 4.1666666e-05, %v522_v11  ;;  %v513_v17 = vsub.f32 %v511_v12, %v512_v14 }
  0x64   : > { %v524_v15 = vfloor.f32 %v523_v13  ;;  %v514_v19 = vmul.f32 0.5, %v513_v17 }
  0x66   : > { %v525_v18 = vsub.f32 %v523_v13, %v524_v15 }
  0x68   : > { %v526_v20 = vmul.f32 0.5, %v525_v18 }
  0x6a   : > { %v527_v23 = vadd.f32 %v526_v20, %v514_v19 }
  0xdb   : > { %v540_v24 = vpop.permute.xlu0 %539 }
  0xdc   : > { %v542_v25 = vmul.f32 %v1109_v22, %v540_v24 }
  0xde   : > { %v543_v26 = vadd.f32 %v542_v25, %v527_v23 }
  0xe0   : > { %544 = vrot.lane.b32.xlu0 %v543_v26, %s1476_s21 }
 0x152   : > { %v545_v27 = vpop.permute.xlu0 %544 }
 0x153   : > { %v547_v28 = vsel %vm546_vm1, %v545_v27, 0.0 }
 0x154   : > { %v548_v29 = vadd.f32 %v547_v28, %v543_v26 }
 0x156   : > { %549 = vrot.lane.b32.xlu1 %v548_v29, %s1477_s28 }
 0x1c8   : > { %v550_v30 = vpop.permute.xlu1 %549 }
 0x1c9   : > { %v552_v31 = vsel %vm551_vm2, %v550_v30, 0.0 }
 0x1ca   : > { %v553_v32 = vadd.f32 %v552_v31, %v548_v29 }
 0x1cc   : > { %554 = vrot.lane.b32.xlu1 %v553_v32, %s1478_s17 }
 0x23e   : > { %v555_v33 = vpop.permute.xlu1 %554 }
 0x23f   : > { %v557_v34 = vsel %vm556_vm3, %v555_v33, 0.0 }
 0x240   : > { %v558_v35 = vadd.f32 %v557_v34, %v553_v32 }
 0x242   : > { %559 = vrot.lane.b32.xlu0 %v558_v35, %s1479_s20 }
 0x2b4   : > { %v560_v36 = vpop.permute.xlu0 %559 }
 0x2b5   : > { %v562_v37 = vsel %vm561_vm4, %v560_v36, 0.0 }
 0x2b6   : > { %v563_v38 = vadd.f32 %v562_v37, %v558_v35 }
 0x2b8   : > { %564 = vrot.lane.b32.xlu1 %v563_v38, %s1480_s30 }
 0x32a   : > { %v565_v39 = vpop.permute.xlu1 %564 }
 0x32b   : > { %v567_v40 = vsel %vm566_vm5, %v565_v39, 0.0 }
 0x32c   : > { %v568_v41 = vadd.f32 %v567_v40, %v563_v38 }
 0x32e   : > { %569 = vrot.lane.b32.xlu0 %v568_v41, %s1481_s18 }
 0x3a0   : > { %v570_v42 = vpop.permute.xlu0 %569 }
 0x3a1   : > { %v572_v43 = vsel %vm571_vm6, %v570_v42, 0.0 }
 0x3a2   : > { %v573_v44 = vadd.f32 %v572_v43, %v568_v41 }
 0x3a4   : > { %574 = vrot.lane.b32.xlu1 %v573_v44, %s1482_s0 }
 0x414   : > { %581 = sbr.rel (%p1110_p0) target bundleno = 1051 (0x41b), region = 64 }
 0x416   : > { %v575_v45 = vpop.permute.xlu1 %574 }
 0x417   : > { %v577_v46 = vsel %vm576_vm7, %v575_v45, 0.0 }
 0x418   : > { %v578_v47 = vadd.f32 %v577_v46, %v573_v44 }
 0x419   : > { %vm582_vm8 = vcmask 7168   ;;  %v1483_v48 = vmov 0.0  }
 0x41a   : > { %583 = vst.msk [vmem:[#allocation2] sm:$0xff] %vm582_vm8, %v1483_v48 }
 0x41b PF: > { %1277 = vset.pattern.permute.xlu0 %v1474_v0  ;;  %1136 = vmatprep.subr.mxu0 %v1475_v21  ;;  %v632_v50 = vld [vmem:[#allocation3 + $0x38] sm:$0xff]  ;;  %v631_v51 = vld [vmem:[#allocation3 + $0x30] sm:$0xff]  ;;  %s599_s23 = ssub.f32 1.0, %s1702_s3  ;;  %v630_v52 = vld [vmem:[#allocation3 + $0x28] sm:$0xff]  ;;  %v1484_v54 = vmov 63   ;;  %v597_v60 = vstv %s1702_s3  ;;  %s1485_s27 = smov 127   ;;  %v603_v7 = vstv %s1718_s26 }
 0x41c   : > { %1137 = vmatpush3.msra.mxu0 %v632_v50  ;;  %s605_s29 = ssub.f32 1.0, %s1718_s26  ;;  %v629_v53 = vld [vmem:[#allocation3 + $0x20] sm:$0xff]  ;;  %1278 = vset.pattern.permute.xlu1 %v1484_v54  ;;  %v628_v56 = vld [vmem:[#allocation3 + $0x18] sm:$0xff]  ;;  %v627_v57 = vld [vmem:[#allocation3 + $0x10] sm:$0xff]  ;;  %vm1486_vm9 = vmmov 0   ;;  %s1487_s3 = smov 63  }
 0x41d   : > { %1138 = vmatprep.subr.mxu0 %v1475_v21  ;;  %v600_v55 = vstv %s599_s23  ;;  %v626_v63 = vld [vmem:[#allocation3 + $0x8] sm:$0xff]  ;;  %v625_v3 = vld [vmem:[#allocation3] sm:$0xff]  ;;  %1152 = vmatprep.mubr.msk.f32.mxu0 %vm1486_vm9, %v1475_v21  ;;  %s1488_s21 = smov 65   ;;  %vm646_vm10 = vcmask 523264   ;;  %vm595_vm11 = vcmask 7168   ;;  %s1121_s20 = sshll.u32 %s1456_s13, 2 }
 0x41e   : > { %1139 = vmatpush3.msra.mxu0 %v631_v51  ;;  %v606_v59 = vstv %s605_s29  ;;  %v840_v17 = vld [vmem:[%s494_s22] sm:$0x1]  ;;  %v852_v23 = vsub.s32 0, %v1705_v5  ;;  %s1746_s18 = sadd.s32 %s1452_s12, %s1121_s20  ;;  %v848_v25 = vld [vmem:[%s405_s1] sm:$0xff]  ;;  %s902_s22 = sshll.u32 %s469_s19, 4  ;;  %s903_s22 = int_to_ptr.vmem [resolvable:$true] %s902_s22 }
 0x41f   : > { %1140 = vmatprep.subr.mxu0 %v1475_v21  ;;  %vm841_vm12 = vcmp.gt.f32.partialorder %v840_v17, 0.0  ;;  %s1122_s25 = sshll.u32 %s1746_s18, 7  ;;  %s1899_s0 = sld [smem:[#allocation25_spill]] }
 0x420   : > { %1141 = vmatpush3.msra.mxu0 %v630_v52  ;;  %v1118_v18 = vsel %vm841_vm12, 1.0, %v1475_v21  ;;  %s872_s12 = scalar_lea.sflag [#allocation10], %s1676_s4  ;;  %s1338_s29 = scalar_lea.vmem %s903_s22, 128 }
 0x421   : > { %v584_v49 = vld [vmem:[#allocation2] sm:$0xff]  ;;  %1142 = vmatprep.subr.mxu0 %v1475_v21  ;;  %v844_v19 = vmul.f32 0.003, %v1118_v18  ;;  %v845_v20 = vsub.f32 1.0, %v1118_v18  ;;  %p1339_p3 = scmp.ne.s32.totalorder %s903_s22, %s1338_s29  ;;  %s1489_s1 = smov [#allocation9]  }
 0x422   : > { %587 = vperm.xlu0 %1277, %v584_v49   ;;  %1143 = vmatpush3.msra.mxu0 %v629_v53  ;;  %v601_v61 = vmul.f32 %v600_v55, %v584_v49 }
 0x423   : > { %1144 = vmatprep.subr.mxu0 %v1475_v21  ;;  %v846_v22 = vmul.f32 0.033333335, %v845_v20  ;;  %p1340_p5 = pnand %p1339_p3, %p1635_p11 }
 0x424   : > { %1145 = vmatpush3.msra.mxu0 %v628_v56 }
 0x425   : > { %1146 = vmatprep.subr.mxu0 %v1475_v21  ;;  %v847_v24 = vadd.f32 %v846_v22, %v844_v19  ;;  %s900_s23 = scalar_lea.hbm %s1899_s0, %s1122_s25  ;;  %p1341_p4 = pneg %p1340_p5 }
 0x426   : > { %1147 = vmatpush3.msra.mxu0 %v627_v57 }
 0x427   : > { %1148 = vmatprep.subr.mxu0 %v1475_v21  ;;  %v853_v26 = vrot.slane %v847_v24, %v852_v23 }
 0x428   : > { %1149 = vmatpush3.msra.mxu0 %v626_v63 }
 0x429   : > { %1150 = vmatprep.subr.mxu0 %v1475_v21  ;;  %v1753_v21 = vmul.f32 %v853_v26, %v848_v25 }
 0x42a   : > { %1151 = vmatpush3.msra.mxu0 %v625_v3 }
 0x42b   : > { %865 = vst [vmem:[%s469_s19] sm:$0xff] %v1753_v21 }
 0x49d   : > { %v588_v58 = vpop.permute.xlu0 %587 }
 0x49e   : > { %v590_v62 = vadd.f32 %v588_v58, %v578_v47 }
 0x4a0   : > { %v607_v0 = vmul.f32 %v606_v59, %v590_v62  ;;  %v598_v1 = vmul.f32 %v597_v60, %v590_v62  ;;  %v604_v9 = vmul.f32 %v603_v7, %v590_v62 }
 0x4a2   : > { %609 = vrot.lane.b32.xlu1 %v607_v0, %s1485_s27  ;;  %v602_v2 = vadd.f32 %v601_v61, %v598_v1  ;;  %s1342_s27 = sshll.u32 %s1489_s1, 4  ;;  %s1343_s27 = int_to_ptr.vmem [resolvable:$false] %s1342_s27 }
 0x4a3   : > { %p1345_p6 = scmp.lt.s32.totalorder %s903_s22, %s1343_s27 }
 0x4a4   : > { %v613_v4 = vfloor.f32 %v602_v2 }
 0x4a6   : > { %616 = vrot.lane.b32.xlu1 %v613_v4, %s1487_s3  ;;  %621 = vperm.xlu0 %1277, %v613_v4   ;;  %v614_v6 = vsub.f32 %v602_v2, %v613_v4  ;;  %s1344_s3 = scalar_lea.vmem %s1343_s27, 256 }
 0x4a7   : > { %p1346_p7 = scmp.lt.s32.totalorder %s1344_s3, %s1338_s29 }
 0x4a9   : > { %p1347_p9 = por %p1346_p7, %p1345_p6 }
 0x4aa   : > { %636 = vperm.xlu0 %1277, %v614_v6  }
 0x4ab   : > { %p1348_p13 = pnand %p1347_p9, %p1341_p4 }
 0x4ae   : > { %592 = vrot.lane.b32.xlu0 %v590_v62, %s1488_s21 }
 0x4af   : > { %1279 = vset.pattern.permute.xlu0 %v1484_v54 }
 0x514   : > { %v610_v8 = vpop.permute.xlu1 %609 }
 0x515   : > { %v612_v10 = vadd.f32 %v610_v8, %v604_v9 }
 0x518   : > { %v617_v11 = vpop.permute.xlu1 %616 }
 0x519   : > { %v619_v12 = vsub.f32 %v612_v10, %v617_v11 }
 0x51b   : > { %723 = vperm.xlu1 %1278, %v619_v12  }
 0x521   : > { %v622_v13 = vpop.permute.xlu0 %621 }
 0x522   : > { %v624_v14 = vsub.f32 %v590_v62, %v622_v13 }
 0x524   : > { %1153 = vmatmul.mubr.msk.f32.vlgmr.msra.gmra.mxu0 %vm646_vm10, %v624_v14 }
 0x525   : > { %v637_v15 = vpop.permute.xlu0 %636 }
 0x529   : > { %v593_v16 = vpop.permute.xlu0 %592 }
 0x52a   : > { %596 = vst.msk [vmem:[#allocation2] sm:$0xff] %vm595_vm11, %v593_v16 }
 0x52b   : > { %1351 = shalt.err (!%p1348_p13)
}
 0x52c   : > { %s1352_s21 = scalar_lea.hbm %s900_s23, 128  ;;  %s1356_s17 = scalar_lea.hbm %s1899_s0, 1024 }
 0x52d   : > { %p1353_p10 = scmp.ne.s32.totalorder %s900_s23, %s1352_s21  ;;  %p1357_p12 = scmp.lt.s32.totalorder %s900_s23, %s1899_s0 }
 0x52e   : > { %p1358_p2 = scmp.lt.s32.totalorder %s1356_s17, %s1352_s21 }
 0x52f   : > { %p1354_p1 = pnand %p1353_p10, %p1635_p11 }
 0x530   : > { %p1359_p0 = por %p1358_p2, %p1357_p12 }
 0x531   : > { %p1355_p8 = pneg %p1354_p1 }
 0x533   : > { %p1360_p3 = pnand %p1359_p0, %p1355_p8 }
 0x535   : > { %1363 = shalt.err (!%p1360_p3)
}
 0x536   : > { %1166 = dma.vmem_to_hbm [thread:$0]  (%p1635_p11), %s903_s22, 128, %s900_s23, %s872_s12   ;;  %v1776_v5 = vrot.slane %v1118_v18, %v852_v23  ;;  %v1490_v47 = vmov 683565275   ;;  %v1491_v49 = vmov 2475754826  }
 0x537   : > { %s1900_s1 = sld [smem:[#allocation22_spill]]  ;;  %v1492_v52 = vmov 2131351028   ;;  %v1493_v55 = vmov 2102212464   ;;  %s887_s22 = sshll.u32 %s462_s8, 4  ;;  %s888_s22 = int_to_ptr.vmem [resolvable:$true] %s887_s22 }
 0x538   : > { %s1901_s19 = sld [smem:[#allocation23_spill]]  ;;  %v1494_v58 = vmov 920167782   ;;  %v1495_v61 = vmov 1326507024   ;;  %s867_s17 = scalar_lea.sflag [#allocation5], %s1676_s4 }
 0x539   : > { %s1902_s21 = sld [smem:[#allocation24_spill]]  ;;  %s1364_s20 = scalar_lea.vmem %s888_s22, 128 }
 0x53a   : > { %p1365_p5 = scmp.ne.s32.totalorder %s888_s22, %s1364_s20  ;;  %s1496_s13 = smov [#allocation8]  }
 0x53b   : > { %s1368_s26 = sshll.u32 %s1496_s13, 4  ;;  %s1369_s26 = int_to_ptr.vmem [resolvable:$false] %s1368_s26 }
 0x53c   : > { %p1366_p4 = pnand %p1365_p5, %p1635_p11  ;;  %s1370_s29 = scalar_lea.vmem %s1369_s26, 256 }
 0x53d   : > { %v1111_v27 = vld [vmem:[%s1900_s1] ss:$0 sm:$0xff]  ;;  %p1371_p7 = scmp.lt.s32.totalorder %s888_s22, %s1369_s26  ;;  %p1372_p9 = scmp.lt.s32.totalorder %s1370_s29, %s1364_s20 }
 0x53e   : > { %v1113_v28 = vld [vmem:[%s1901_s19] ss:$0 sm:$0xff]  ;;  %v645_v30 = vmul.f32 %v1111_v27, %v637_v15  ;;  %p1367_p6 = pneg %p1366_p4 }
 0x53f   : > { %s885_s28 = scalar_lea.hbm %s1902_s21, %s1122_s25  ;;  %p1373_p13 = por %p1372_p9, %p1371_p7 }
 0x541   : > { %p1374_p10 = pnand %p1373_p13, %p1367_p6 }
 0x596   : > { %v724_v29 = vpop.permute.xlu1 %723 }
 0x597   : > { %v732_v32 = vmul.f32 %v1113_v28, %v724_v29 }
 0x5e4   : > { %v716_v31 = vpop.f32.mrf.mxu0 }
 0x5e5   : > { %v717_v33 = vadd.f32 %v716_v31, %v645_v30 }
 0x5e6   : > { %v1154_v34 = vpop.f32.mrf.mxu0 }
 0x5e7   : > { %v733_v35 = vadd.f32 %v732_v32, %v717_v33 }
 0x5e9   : > { %v1784_v36 = vmul.f32 12.566371, %v733_v35 }
 0x5eb   : > { %v738_v37 = vand.u32 2139095040, %v1784_v36  ;;  %v735_v41 = vand.u32 2147483647, %v1784_v36  ;;  %vm737_vm4 = vcmp.lt.s32.totalorder %v1784_v36, 0  ;;  %vm827_vm9 = vweird.f32 %v1784_v36 }
 0x5ed   : > { %v739_v38 = vshrl.u32 %v738_v37, 23  ;;  %v742_v44 = vand.u32 8388607, %v735_v41  ;;  %vm736_vm5 = vcmp.le.f32.partialorder %v735_v41, 0.7853982 }
 0x5ef   : > { %v1114_v39 = vadd.s32 4294967169, %v739_v38  ;;  %v743_v63 = vor.u32 8388608, %v742_v44 }
 0x5f1   : > { %v745_v40 = vadd.s32 1, %v1114_v39  ;;  %v783_v14 = vshll.u32 %v743_v63, 8 }
 0x5f3   : > { %vm746_vm13 = vcmp.gt.s32.totalorder %v745_v40, 0 }
 0x5f4   : > { %v747_v42 = vsel %vm746_vm13, %v745_v40, 0 }
 0x5f5   : > { %v749_v43 = vand.u32 31, %v747_v42  ;;  %v748_v46 = vshrl.u32 %v747_v42, 5 }
 0x5f7   : > { %v750_v45 = vsub.s32 32, %v749_v43  ;;  %v752_v48 = vshll.u32 %v1490_v47, %v749_v43  ;;  %v755_v50 = vshll.u32 %v1491_v49, %v749_v43  ;;  %v758_v54 = vshll.u32 %v1492_v52, %v749_v43 }
 0x5f8   : > { %v761_v57 = vshll.u32 %v1493_v55, %v749_v43  ;;  %v764_v60 = vshll.u32 %v1494_v58, %v749_v43  ;;  %vm767_vm14 = vcmp.lt.s32.totalorder %v748_v46, 1  ;;  %vm770_vm15 = vcmp.lt.s32.totalorder %v748_v46, 4 }
 0x5f9   : > { %v753_v51 = vshrl.u32 %v1491_v49, %v750_v45  ;;  %v756_v53 = vshrl.u32 %v1492_v52, %v750_v45  ;;  %v759_v56 = vshrl.u32 %v1493_v55, %v750_v45  ;;  %v762_v59 = vshrl.u32 %v1494_v58, %v750_v45 }
 0x5fa   : > { %v765_v62 = vshrl.u32 %v1495_v61, %v750_v45  ;;  %v751_v9 = vshrl.u32 %v1490_v47, %v750_v45  ;;  %vm769_vm0 = vcmp.lt.s32.totalorder %v748_v46, 3  ;;  %vm768_vm1 = vcmp.lt.s32.totalorder %v748_v46, 2 }
 0x5fb   : > { %v754_v0 = vor.u32 %v753_v51, %v752_v48  ;;  %v757_v1 = vor.u32 %v756_v53, %v755_v50  ;;  %v760_v2 = vor.u32 %v759_v56, %v758_v54  ;;  %v763_v3 = vor.u32 %v762_v59, %v761_v57 }
 0x5fc   : > { %v766_v4 = vor.u32 %v765_v62, %v764_v60 }
 0x5fd   : > { %v772_v6 = vsel %vm770_vm15, %v760_v2, 2102212464  ;;  %v775_v7 = vsel %vm767_vm14, %v754_v0, %v757_v1  ;;  %v779_v8 = vsel %vm767_vm14, %v757_v1, %v760_v2  ;;  %v776_v10 = vsel %vm770_vm15, %v763_v3, 920167782 }
 0x5fe   : > { %v780_v11 = vsel %vm770_vm15, %v766_v4, 1326507024  ;;  %v777_v12 = vsel %vm769_vm0, %v760_v2, %v776_v10  ;;  %v771_v15 = vsel %vm767_vm14, %v751_v9, %v754_v0  ;;  %v773_v16 = vsel %vm769_vm0, %v757_v1, %v772_v6 }
 0x5ff   : > { %v781_v13 = vsel %vm769_vm0, %v763_v3, %v780_v11  ;;  %v778_v17 = vsel %vm768_vm1, %v775_v7, %v777_v12  ;;  %v774_v24 = vsel %vm768_vm1, %v771_v15, %v773_v16 }
 0x600   : > { %v782_v18 = vsel %vm768_vm1, %v779_v8, %v781_v13  ;;  %v1793_v22 = vmul.u32.u64.low %v783_v14, %v778_v17  ;;  %v1794_v23 = vmul.u32.u64.high %v783_v14, %v778_v17, %v1793_v22  ;;  %v790_v26 = vmul.u32 %v783_v14, %v774_v24 }
 0x601   : > { %v1790_v19 = vmul.u32.u64.low %v783_v14, %v782_v18  ;;  %v1791_v20 = vmul.u32.u64.high %v783_v14, %v782_v18, %v1790_v19 }
 0x602   : > { %v793_v25 = vadd.s32 1, %v1794_v23 }
 0x603   : > { %vm792_vm2 = vc.u32 %v1791_v20, %v1793_v22  ;;  %v791_v39 = vadd.s32 %v1793_v22, %v1791_v20 }
 0x604   : > { %v794_v27 = vsel %vm792_vm2, %v793_v25, %v1794_v23 }
 0x605   : > { %v795_v28 = vadd.s32 %v794_v27, %v790_v26 }
 0x607   : > { %v796_v29 = vadd.s32 536870912, %v795_v28 }
 0x609   : > { %v797_v30 = vshrl.u32 %v796_v29, 30 }
 0x60b   : > { %v798_v31 = vshll.u32 %v797_v30, 30  ;;  %v821_v53 = vsub.s32 4, %v797_v30 }
 0x60d   : > { %v799_v32 = vsub.s32 %v795_v28, %v798_v31  ;;  %v822_v56 = vsel %vm737_vm4, %v821_v53, %v797_v30 }
 0x60e   : > { %v824_v57 = vsel %vm736_vm5, 0, %v822_v56 }
 0x60f   : > { %v801_v33 = vsub.s32 0, %v799_v32  ;;  %v828_v58 = vadd.s32 3, %v824_v57 }
 0x611   : > { %v1115_v34 = vmin.u32 %v801_v33, %v799_v32  ;;  %v829_v59 = vand.u32 3, %v828_v58 }
 0x613   : > { %v803_v35 = vclz %v1115_v34  ;;  %vm834_vm6 = vcmp.eq.s32.totalorder %v829_v59, 2  ;;  %vm831_vm7 = vcmp.eq.s32.totalorder %v829_v59, 0  ;;  %vm830_vm8 = vcmp.lt.s32.totalorder %v829_v59, 2 }
 0x615   : > { %v1116_v37 = vadd.s32 4294967294, %v803_v35 }
 0x617   : > { %vm1117_vm3 = vcmp.lt.s32.totalorder %v1116_v37, 0 }
 0x618   : > { %v806_v38 = vsel %vm1117_vm3, 0, %v1116_v37 }
 0x619   : > { %v807_v40 = vsub.s32 32, %v806_v38  ;;  %v811_v42 = vsub.s32 4294967266, %v806_v38  ;;  %v808_v43 = vshll.u32 %v799_v32, %v806_v38 }
 0x61b   : > { %v809_v44 = vshrl.u32 %v791_v39, %v807_v40  ;;  %v812_v45 = vadd.s32 127, %v811_v42 }
 0x61d   : > { %v810_v46 = vor.u32 %v809_v44, %v808_v43  ;;  %v813_v47 = vshll.u32 %v812_v45, 23 }
 0x61f   : > { %v814_v48 = vor.u32 4788187, %v813_v47  ;;  %v817_v50 = vcvt.s32.f32 %v810_v46 }
 0x621   : > { %v815_v49 = vand.u32 2147483647, %v814_v48 }
 0x623   : > { %v818_v51 = vmul.f32 %v817_v50, %v815_v49 }
 0x625   : > { %v819_v52 = vxor.u32 2147483648, %v818_v51 }
 0x627   : > { %v820_v54 = vsel %vm737_vm4, %v819_v52, %v818_v51 }
 0x628   : > { %v823_v55 = vsel %vm736_vm5, %v1784_v36, %v820_v54 }
 0x629   : > { %1280 = vcosq.f32 %v823_v55 }
 0x62a   : > { %1282 = vsinq.f32 %v823_v55 }
 0x636   : > { %v1281_v60 = vpop.eup %1280 }
 0x637   : > { %v1283_v61 = vpop.eup %1282  ;;  %v835_v62 = vxor.u32 2147483648, %v1281_v60 }
 0x638   : > { %v832_v63 = vxor.u32 2147483648, %v1283_v61 }
 0x639   : > { %v836_v41 = vsel %vm834_vm6, %v835_v62, %v1283_v61 }
 0x63a   : > { %v833_v0 = vsel %vm831_vm7, %v1281_v60, %v832_v63 }
 0x63b   : > { %v837_v1 = vsel %vm830_vm8, %v833_v0, %v836_v41 }
 0x63c   : > { %v838_v2 = vsel %vm827_vm9, nan, %v837_v1 }
 0x63d   : > { %v839_v3 = vmul.f32 0.1, %v838_v2 }
 0x63f   : > { %v862_v4 = vmul.f32 %v1776_v5, %v839_v3 }
 0x641   : > { %v863_v6 = vadd.f32 %v862_v4, %v1753_v21 }
 0x643   : > { %864 = vst [vmem:[%s462_s8] sm:$0xff] %v863_v6 }
 0x644   : > { %1377 = shalt.err (!%p1374_p10)
}
 0x645   : > { %s1378_s18 = scalar_lea.hbm %s885_s28, 128  ;;  %s1382_s8 = scalar_lea.hbm %s1902_s21, 1024 }
 0x646   : > { %p1379_p1 = scmp.ne.s32.totalorder %s885_s28, %s1378_s18  ;;  %p1383_p2 = scmp.lt.s32.totalorder %s885_s28, %s1902_s21 }
 0x647   : > { %p1384_p0 = scmp.lt.s32.totalorder %s1382_s8, %s1378_s18 }
 0x648   : > { %p1380_p8 = pnand %p1379_p1, %p1635_p11 }
 0x649   : > { %p1385_p3 = por %p1384_p0, %p1383_p2 }
 0x64a   : > { %p1381_p12 = pneg %p1380_p8 }
 0x64c   : > { %p1386_p5 = pnand %p1385_p3, %p1381_p12 }
 0x64e   : > { %1389 = shalt.err (!%p1386_p5)
}
 0x64f   : > { %1165 = dma.vmem_to_hbm [thread:$0]  (%p1635_p11), %s888_s22, 128, %s885_s28, %s867_s17  }
 0x650 PF: > { %s1903_s27 = sld [smem:[#allocation15_spill]]  ;;  %p1187_p4 = scmp.ge.s32.totalorder %s1468_s16, 2 }
 0x651   : > { %s1904_s3 = sld [smem:[#allocation16_spill]] }
 0x656   : > { %s914_s19 = sand.u32 1, %s1903_s27  }
 0x657   : > { %p1905_p6 = scmp.ne.s32.totalorder %s1904_s3, 0  ;;  %s915_s23 = scalar_lea.sflag [#allocation5], %s914_s19 }
 0x659   : > { %p1178_p7 = pnand %p1187_p4, %p1905_p6 }
 0x65b   : > { %p1179_p9 = pneg %p1178_p7 }
 0x65d   : > { %1431 = dma.done.wait (%p1179_p9), %s915_s23, 128  }
 0x65e   : > { %1433 = vsyncadd (%p1179_p9), %s915_s23, 4294967168  ;;  %s924_s12 = scalar_lea.sflag [#allocation10], %s914_s19 }
 0x65f   : > { %1435 = dma.done.wait (%p1179_p9), %s924_s12, 128  }
 0x660   : > { %1437 = vsyncadd (%p1179_p9), %s924_s12, 4294967168  ;;  %s30_s16 = sadd.s32 1, %s1468_s16   ;;  %s1906_s22 = sld [smem:[#allocation17_spill]] }
 0x661   : > { %p27_p13 = scmp.ge.s32.totalorder %s30_s16, 10   ;;  %s1907_s30 = smov %s1444_s10 }
 0x662   : > { %s1908_s10 = smov %s1448_s11  ;;  %s1909_s11 = smov %s1652_s5 }
 0x663   : > { %s1910_s12 = smov %s1460_s14  ;;  %s1911_s13 = smov %s1464_s15 }
 0x664   : > { %s1913_s15 = smov %s1919_s24  ;;  %29 = sbr.rel (!%p27_p13) target bundleno = 18 (0x12), region = 135 }
 0x666   : > { %s1912_s14 = smov %s1906_s22 }
 0x669   :  { %929 = vsyncpa [#allocation4], 1 }
 0x66a   :  { %931 = vsyncpa [#allocation4 + $0x1], 1 }
 0x66b   :  { %932 = vsyncpa [#allocation7], 1 }
 0x66c   :  { %934 = vsyncpa [#allocation7 + $0x1], 1 }
 0x66d   :  { %935 = vsyncpa [#allocation5], 1 }
 0x66e   :  { %937 = vsyncpa [#allocation5 + $0x1], 1 }
 0x66f   :  { %938 = vsyncpa [#allocation10], 1 }
 0x670   :  { %940 = vsyncpa [#allocation10 + $0x1], 1 }

</bundles_post_ra>
